<compile_context>
chip_gen: v6e
topology: v6e:2x2x1
jax: 0.10.0
libtpu: 0.0.40
codegen_flags: <defaults>
</compile_context>

<pallas_src>
import functools

import jax
import jax.numpy as jnp
from jax import lax
from jax.experimental import pallas as pl
from jax.experimental.pallas import tpu as pltpu

# Small, module-consistent hyperparameters
WORD_SIZE = 128     # vocab size (word_size)
EMB_DIM = 32        # emb_dim
RNN_HIDDEN = 32     # rnn_hidden_num
BATCH = 2
SEQ = 8


def pmodel_kernel(B, T, tok_ref, pw_ref, cb_ref, rnn_out_ref, pred_ref):
    """Whole forward in one invocation.

    tok_ref     : (T*B, 1)  int32, VMEM  token ids, time-major rows (t*B + b)
    pw_ref      : (V+H, H)  f32,   VMEM  rows 0:V   = P = emb @ w_ih^T + (b_ih+b_hh)
                                         rows V:V+H = w_hh^T
    cb_ref      : (H+1, V)  f32,   VMEM  rows 0:H   = w_cls^T
                                         row  H     = b_cls
    rnn_out_ref : (T*B, H)  f32          hidden states, time-major (== rnn_out1, eval dropout)
    pred_ref    : (T*B, 1)  i32          argmax over vocab, time-major
    """
    TB = T * B
    H = pw_ref.shape[1]
    V = cb_ref.shape[1]

    # 1) One-hot gather of the fused projection table (single MXU dot).
    #    xw[row] == emb[tok[row]] @ w_ih^T + b_ih + b_hh   (row selection
    #    commutes with the matmul, so this is exact in f32).
    tok = tok_ref[...]                                           # (TB, 1) int32
    vocab_iota = lax.broadcasted_iota(jnp.int32, (TB, V), 1)     # (TB, V)
    onehot = (tok == vocab_iota).astype(jnp.float32)             # (TB, V)
    proj_tbl = pw_ref[0:V, :]                                    # (V, H)
    xw = jnp.dot(onehot, proj_tbl,
                 preferred_element_type=jnp.float32)             # (TB, H) time-major

    # 2) Serial recurrence — the only latency-bound chain.  Hidden state is a
    #    loop-carried register value; T is static so the loop fully unrolls.
    #    One dot + one add + one tanh (EUP) per step.
    whh = pw_ref[V:V + H, :]                                     # (H, H)
    h = jnp.zeros((B, H), dtype=jnp.float32)
    hs = []
    for t in range(T):
        h = jnp.tanh(xw[t * B:(t + 1) * B, :]
                     + jnp.dot(h, whh, preferred_element_type=jnp.float32))
        hs.append(h)

    # 3) Hidden states kept in natural time-major block order: one lane-dense
    #    store, no per-row reorder.
    hs_tm = jnp.concatenate(hs, axis=0)                          # (TB, H)
    rnn_out_ref[...] = hs_tm
    # TODO(synk): nn.Dropout(0.2) is identity at inference (eval); training-mode
    # stochastic dropout is not implemented here.

    # 4) Hoisted classifier + argmax: one dot, one bias add, one lane-axis
    #    reduction, one (TB,1) store in the reduction's natural layout.
    wcls = cb_ref[0:H, :]                                        # (H, V)
    bcls = cb_ref[H:H + 1, :]                                    # (1, V)
    logits = jnp.dot(hs_tm, wcls,
                     preferred_element_type=jnp.float32) + bcls  # (TB, V)
    pred_ref[...] = jnp.argmax(logits, axis=-1,
                               keepdims=True).astype(jnp.int32)  # (TB, 1)


def pmodel_forward(tokens, emb, w_ih, w_hh, b_ih, b_hh, w_cls, b_cls):
    """Inference forward: returns (argmax_pred (B,T) int32, rnn_out (B,T,H) f32)."""
    B, T = tokens.shape
    V, E = emb.shape
    H = w_hh.shape[0]

    # Fused projection table (exact: row selection commutes with matmul).
    # Computed once in the wrapper so the kernel sees 1 DMA instead of 3.
    proj_tbl = emb @ w_ih.T + (b_ih + b_hh)                      # (V, H)
    pw = jnp.concatenate([proj_tbl, w_hh.T], axis=0)             # (V+H, H)
    cb = jnp.concatenate([w_cls.T, b_cls.reshape(1, V)], axis=0)  # (H+1, V)
    tok_tm = tokens.T.reshape(T * B, 1).astype(jnp.int32)        # time-major rows t*B+b

    rnn_out_tm, pred_tm = pl.pallas_call(
        functools.partial(pmodel_kernel, B, T),
        out_shape=(
            jax.ShapeDtypeStruct((T * B, H), jnp.float32),
            jax.ShapeDtypeStruct((T * B, 1), jnp.int32),
        ),
        in_specs=[
            pl.BlockSpec(memory_space=pltpu.MemorySpace.VMEM),   # tokens (T*B,1) i32
            pl.BlockSpec(memory_space=pltpu.MemorySpace.VMEM),   # [P ; w_hh^T]
            pl.BlockSpec(memory_space=pltpu.MemorySpace.VMEM),   # [w_cls^T ; b_cls]
        ],
        out_specs=(
            pl.BlockSpec(memory_space=pltpu.MemorySpace.VMEM),
            pl.BlockSpec(memory_space=pltpu.MemorySpace.VMEM),
        ),
    )(tok_tm, pw, cb)

    # Kernel outputs are time-major; the (T,B,*)->(B,T,*) transpose touches ~2 KiB.
    rnn_out = rnn_out_tm.reshape(T, B, H).transpose(1, 0, 2)     # (B, T, H)
    pred = pred_tm.reshape(T, B).T                               # (B, T)
    return pred, rnn_out


def _reference_forward(tokens, emb, w_ih, w_hh, b_ih, b_hh, w_cls, b_cls):
    """Pure-JAX reference matching torch semantics (eval-mode dropout)."""
    x = emb[tokens]                                  # (B, T, E)
    B, T, E = x.shape
    H = w_hh.shape[0]

    def step(h, x_t):
        h_new = jnp.tanh(x_t @ w_ih.T + b_ih + h @ w_hh.T + b_hh)
        return h_new, h_new

    h0 = jnp.zeros((B, H), jnp.float32)
    _, hs = lax.scan(step, h0, jnp.transpose(x, (1, 0, 2)))  # (T, B, H)
    rnn_out = jnp.transpose(hs, (1, 0, 2))                   # (B, T, H)
    logits = rnn_out @ w_cls.T + b_cls                       # (B, T, V)
    return jnp.argmax(logits, axis=-1).astype(jnp.int32), rnn_out


if __name__ == "__main__":
    key = jax.random.PRNGKey(0)
    k_tok, k_emb, k_wih, k_whh, k_bih, k_bhh, k_wc, k_bc = jax.random.split(key, 8)

    tokens = jax.random.randint(k_tok, (BATCH, SEQ), 0, WORD_SIZE, dtype=jnp.int32)

    # Deterministic parameter init (shapes follow nn.Embedding / nn.RNN / nn.Linear).
    emb = jax.random.normal(k_emb, (WORD_SIZE, EMB_DIM), jnp.float32) * 0.1
    w_ih = jax.random.normal(k_wih, (RNN_HIDDEN, EMB_DIM), jnp.float32) * 0.1
    w_hh = jax.random.normal(k_whh, (RNN_HIDDEN, RNN_HIDDEN), jnp.float32) * 0.1
    b_ih = jax.random.normal(k_bih, (RNN_HIDDEN,), jnp.float32) * 0.1
    b_hh = jax.random.normal(k_bhh, (RNN_HIDDEN,), jnp.float32) * 0.1
    w_cls = jax.random.normal(k_wc, (WORD_SIZE, RNN_HIDDEN), jnp.float32) * 0.1
    b_cls = jax.random.normal(k_bc, (WORD_SIZE,), jnp.float32) * 0.1

    pred, rnn_out = jax.jit(pmodel_forward)(
        tokens, emb, w_ih, w_hh, b_ih, b_hh, w_cls, b_cls
    )
    jax.block_until_ready((pred, rnn_out))

    ref_pred, ref_rnn = _reference_forward(
        tokens, emb, w_ih, w_hh, b_ih, b_hh, w_cls, b_cls
    )
    assert pred.shape == (BATCH, SEQ) and pred.dtype == jnp.int32
    assert rnn_out.shape == (BATCH, SEQ, RNN_HIDDEN)
    assert jnp.allclose(rnn_out, ref_rnn, atol=1e-5), "rnn_out mismatch"
    assert jnp.array_equal(pred, ref_pred), "argmax mismatch"

    print("KERNEL_OK")
</pallas_src>

<mosaic_0001>
module attributes {stable_mosaic.version = 11 : i64} {
  func.func @pmodel_kernel(%arg0: memref<16x1xi32, #tpu.memory_space<vmem>>, %arg1: memref<160x32xf32, #tpu.memory_space<vmem>>, %arg2: memref<33x128xf32, #tpu.memory_space<vmem>>, %arg3: memref<16x32xf32, #tpu.memory_space<vmem>>, %arg4: memref<16x1xi32, #tpu.memory_space<vmem>>) attributes {dimension_semantics = [], scalar_prefetch = 0 : i64, scratch_operands = 0 : i64, tpu.core_type = #tpu.core_type<tc>} {
    %c0 = arith.constant 0 : index
    %c0_0 = arith.constant 0 : index
    %0 = vector.load %arg0[%c0, %c0_0] : memref<16x1xi32, #tpu.memory_space<vmem>>, vector<16x1xi32>
    %1 = tpu.iota {dimensions = array<i32: 1>} : vector<16x128xi32>
    %2 = vector.broadcast %0 : vector<16x1xi32> to vector<16x128xi32>
    %3 = arith.cmpi eq, %2, %1 : vector<16x128xi32>
    %4 = arith.extui %3 : vector<16x128xi1> to vector<16x128xi32>
    %5 = arith.sitofp %4 : vector<16x128xi32> to vector<16x128xf32>
    %c0_1 = arith.constant 0 : index
    %c0_2 = arith.constant 0 : index
    %6 = vector.load %arg1[%c0_1, %c0_2] : memref<160x32xf32, #tpu.memory_space<vmem>>, vector<128x32xf32>
    %cst = arith.constant dense<0.000000e+00> : vector<16x32xf32>
    %7 = tpu.matmul %5, %6, %cst {dimension_numbers = #tpu.dot_dimension_numbers<[1], [0], [0], [1], [0, 0, 1, 1], [], []>} : vector<16x128xf32>, vector<128x32xf32>, vector<16x32xf32> -> vector<16x32xf32>
    %c128 = arith.constant 128 : index
    %c0_3 = arith.constant 0 : index
    %8 = vector.load %arg1[%c128, %c0_3] : memref<160x32xf32, #tpu.memory_space<vmem>>, vector<32x32xf32>
    %cst_4 = arith.constant 0.000000e+00 : f32
    %9 = vector.broadcast %cst_4 : f32 to vector<2x32xf32>
    %10 = vector.extract_strided_slice %7 {offsets = [0, 0], sizes = [2, 32], strides = [1, 1]} : vector<16x32xf32> to vector<2x32xf32>
    %cst_5 = arith.constant dense<0.000000e+00> : vector<2x32xf32>
    %11 = tpu.matmul %9, %8, %cst_5 {dimension_numbers = #tpu.dot_dimension_numbers<[1], [0], [0], [1], [0, 0, 1, 1], [], []>} : vector<2x32xf32>, vector<32x32xf32>, vector<2x32xf32> -> vector<2x32xf32>
    %12 = arith.addf %10, %11 : vector<2x32xf32>
    %13 = math.tanh %12 : vector<2x32xf32>
    %14 = vector.extract_strided_slice %7 {offsets = [2, 0], sizes = [2, 32], strides = [1, 1]} : vector<16x32xf32> to vector<2x32xf32>
    %cst_6 = arith.constant dense<0.000000e+00> : vector<2x32xf32>
    %15 = tpu.matmul %13, %8, %cst_6 {dimension_numbers = #tpu.dot_dimension_numbers<[1], [0], [0], [1], [0, 0, 1, 1], [], []>} : vector<2x32xf32>, vector<32x32xf32>, vector<2x32xf32> -> vector<2x32xf32>
    %16 = arith.addf %14, %15 : vector<2x32xf32>
    %17 = math.tanh %16 : vector<2x32xf32>
    %18 = vector.extract_strided_slice %7 {offsets = [4, 0], sizes = [2, 32], strides = [1, 1]} : vector<16x32xf32> to vector<2x32xf32>
    %cst_7 = arith.constant dense<0.000000e+00> : vector<2x32xf32>
    %19 = tpu.matmul %17, %8, %cst_7 {dimension_numbers = #tpu.dot_dimension_numbers<[1], [0], [0], [1], [0, 0, 1, 1], [], []>} : vector<2x32xf32>, vector<32x32xf32>, vector<2x32xf32> -> vector<2x32xf32>
    %20 = arith.addf %18, %19 : vector<2x32xf32>
    %21 = math.tanh %20 : vector<2x32xf32>
    %22 = vector.extract_strided_slice %7 {offsets = [6, 0], sizes = [2, 32], strides = [1, 1]} : vector<16x32xf32> to vector<2x32xf32>
    %cst_8 = arith.constant dense<0.000000e+00> : vector<2x32xf32>
    %23 = tpu.matmul %21, %8, %cst_8 {dimension_numbers = #tpu.dot_dimension_numbers<[1], [0], [0], [1], [0, 0, 1, 1], [], []>} : vector<2x32xf32>, vector<32x32xf32>, vector<2x32xf32> -> vector<2x32xf32>
    %24 = arith.addf %22, %23 : vector<2x32xf32>
    %25 = math.tanh %24 : vector<2x32xf32>
    %26 = vector.extract_strided_slice %7 {offsets = [8, 0], sizes = [2, 32], strides = [1, 1]} : vector<16x32xf32> to vector<2x32xf32>
    %cst_9 = arith.constant dense<0.000000e+00> : vector<2x32xf32>
    %27 = tpu.matmul %25, %8, %cst_9 {dimension_numbers = #tpu.dot_dimension_numbers<[1], [0], [0], [1], [0, 0, 1, 1], [], []>} : vector<2x32xf32>, vector<32x32xf32>, vector<2x32xf32> -> vector<2x32xf32>
    %28 = arith.addf %26, %27 : vector<2x32xf32>
    %29 = math.tanh %28 : vector<2x32xf32>
    %30 = vector.extract_strided_slice %7 {offsets = [10, 0], sizes = [2, 32], strides = [1, 1]} : vector<16x32xf32> to vector<2x32xf32>
    %cst_10 = arith.constant dense<0.000000e+00> : vector<2x32xf32>
    %31 = tpu.matmul %29, %8, %cst_10 {dimension_numbers = #tpu.dot_dimension_numbers<[1], [0], [0], [1], [0, 0, 1, 1], [], []>} : vector<2x32xf32>, vector<32x32xf32>, vector<2x32xf32> -> vector<2x32xf32>
    %32 = arith.addf %30, %31 : vector<2x32xf32>
    %33 = math.tanh %32 : vector<2x32xf32>
    %34 = vector.extract_strided_slice %7 {offsets = [12, 0], sizes = [2, 32], strides = [1, 1]} : vector<16x32xf32> to vector<2x32xf32>
    %cst_11 = arith.constant dense<0.000000e+00> : vector<2x32xf32>
    %35 = tpu.matmul %33, %8, %cst_11 {dimension_numbers = #tpu.dot_dimension_numbers<[1], [0], [0], [1], [0, 0, 1, 1], [], []>} : vector<2x32xf32>, vector<32x32xf32>, vector<2x32xf32> -> vector<2x32xf32>
    %36 = arith.addf %34, %35 : vector<2x32xf32>
    %37 = math.tanh %36 : vector<2x32xf32>
    %38 = vector.extract_strided_slice %7 {offsets = [14, 0], sizes = [2, 32], strides = [1, 1]} : vector<16x32xf32> to vector<2x32xf32>
    %cst_12 = arith.constant dense<0.000000e+00> : vector<2x32xf32>
    %39 = tpu.matmul %37, %8, %cst_12 {dimension_numbers = #tpu.dot_dimension_numbers<[1], [0], [0], [1], [0, 0, 1, 1], [], []>} : vector<2x32xf32>, vector<32x32xf32>, vector<2x32xf32> -> vector<2x32xf32>
    %40 = arith.addf %38, %39 : vector<2x32xf32>
    %41 = math.tanh %40 : vector<2x32xf32>
    %42 = tpu.concatenate %13, %17, %21, %25, %29, %33, %37, %41 in 0 : vector<2x32xf32>, vector<2x32xf32>, vector<2x32xf32>, vector<2x32xf32>, vector<2x32xf32>, vector<2x32xf32>, vector<2x32xf32>, vector<2x32xf32> -> vector<16x32xf32>
    %c0_13 = arith.constant 0 : index
    %c0_14 = arith.constant 0 : index
    %43 = vector.load %arg3[%c0_13, %c0_14] : memref<16x32xf32, #tpu.memory_space<vmem>>, vector<16x32xf32>
    tpu.vector_store %arg3[%c0_13, %c0_14], %42 {strides = array<i32>} : memref<16x32xf32, #tpu.memory_space<vmem>>, vector<16x32xf32>,
    %c0_15 = arith.constant 0 : index
    %c0_16 = arith.constant 0 : index
    %44 = vector.load %arg2[%c0_15, %c0_16] : memref<33x128xf32, #tpu.memory_space<vmem>>, vector<32x128xf32>
    %c32 = arith.constant 32 : index
    %c0_17 = arith.constant 0 : index
    %45 = vector.load %arg2[%c32, %c0_17] : memref<33x128xf32, #tpu.memory_space<vmem>>, vector<1x128xf32>
    %cst_18 = arith.constant dense<0.000000e+00> : vector<16x128xf32>
    %46 = tpu.matmul %42, %44, %cst_18 {dimension_numbers = #tpu.dot_dimension_numbers<[1], [0], [0], [1], [0, 0, 1, 1], [], []>} : vector<16x32xf32>, vector<32x128xf32>, vector<16x128xf32> -> vector<16x128xf32>
    %47 = vector.broadcast %45 : vector<1x128xf32> to vector<16x128xf32>
    %48 = arith.addf %46, %47 : vector<16x128xf32>
    %49 = tpu.reduce_index %48 {axis = 1 : i32, kind = #tpu.reduction_kind<arg_max>} : vector<16x128xf32> -> vector<16xi32>
    %50 = vector.shape_cast %49 : vector<16xi32> to vector<16x1xi32>
    %c0_19 = arith.constant 0 : index
    %c0_20 = arith.constant 0 : index
    %51 = vector.load %arg4[%c0_19, %c0_20] : memref<16x1xi32, #tpu.memory_space<vmem>>, vector<16x1xi32>
    tpu.vector_store %arg4[%c0_19, %c0_20], %50 {strides = array<i32>} : memref<16x1xi32, #tpu.memory_space<vmem>>, vector<16x1xi32>,
    return
  }
}

</mosaic_0001>

<bundles_post_ra>
// kernel: pmodel_forward.1
= control target key start
LH: loop header
LB: loop body
LE: loop exit
PB: predicated region body
PF: predicated region fallthrough
CT: control target
= control target key end

     0   :  { %v1100_v0 = vmov 0   ;;  %v1101_v3 = vmov 0.0   ;;  %vm1102_vm0 = vmmov 0   ;;  %v18_v24 = vlaneseq  ;;  %s1334_s0 = inlined_call_operand.vmem [shape: s32[16,1], index: 0, kind: input, shape index: {}]   ;;  %s1335_s1 = inlined_call_operand.vmem [shape: f32[160,32], index: 1, kind: input, shape index: {}]   ;;  %s1336_s3 = inlined_call_operand.vmem [shape: f32[16,32], index: 3, kind: output, shape index: {0}]   ;;  %s1337_s2 = inlined_call_operand.vmem [shape: f32[33,128], index: 2, kind: input, shape index: {}]   ;;  %s1338_s4 = inlined_call_operand.vmem [shape: s32[16,1], index: 4, kind: output, shape index: {1}]  }
   0x1   :  { %1083 = vset.pattern.permute.xlu0 %v1100_v0  ;;  %v16_v1 = vld [vmem:[%s1334_s0] sm:$0xff]  ;;  %v47_v2 = vld [vmem:[%s1335_s1 + $0x78] sm:$0xff]  ;;  %980 = vmatprep.subr.mxu1 %v1101_v3  ;;  %v46_v4 = vld [vmem:[%s1335_s1 + $0x70] sm:$0xff]  ;;  %v1103_v27 = vmov 1.0   ;;  %vm127_vm3 = vcmask 261120   ;;  %vm751_vm4 = vcmask 1041408  }
   0x2   :  { %21 = vperm.xlu0 %1083, %v16_v1   ;;  %945 = vmatprep.subr.mxu0 %v47_v2  ;;  %v17_v5 = vld [vmem:[%s1334_s0 + $0x8] sm:$0xff]  ;;  %v44_v7 = vld [vmem:[%s1335_s1 + $0x60] sm:$0xff]  ;;  %v1153_v8 = vld [vmem:[%s1335_s1 + $0x98] sm:$0xff]  ;;  %v19_v25 = vand.u32 127, %v18_v24  ;;  %vm753_vm5 = vcmask 1043456   ;;  %vm755_vm6 = vcmask 1045504  }
   0x3   :  { %946 = vmatpush3.msra.mxu0 %v47_v2  ;;  %v45_v6 = vld [vmem:[%s1335_s1 + $0x68] sm:$0xff]  ;;  %988 = vmatprep.mubr.msk.f32.mxu1 %vm1102_vm0, %v1101_v3  ;;  %v1158_v9 = vld [vmem:[%s1335_s1 + $0x90] sm:$0xff]  ;;  %v43_v10 = vld [vmem:[%s1335_s1 + $0x58] sm:$0xff]  ;;  %vm856_vm7 = vcmask 7168  }
   0x4   :  { %947 = vmatprep.subr.mxu0 %v46_v4  ;;  %981 = vmatpush3.msra.mxu1 %v1153_v8  ;;  %v1168_v11 = vld [vmem:[%s1335_s1 + $0x88] sm:$0xff]  ;;  %v42_v12 = vld [vmem:[%s1335_s1 + $0x50] sm:$0xff]  ;;  %v1178_v13 = vld [vmem:[%s1335_s1 + $0x80] sm:$0xff] }
   0x5   :  { %948 = vmatpush3.msra.mxu0 %v46_v4  ;;  %982 = vmatprep.subr.mxu1 %v1101_v3  ;;  %v41_v14 = vld [vmem:[%s1335_s1 + $0x48] sm:$0xff]  ;;  %v40_v15 = vld [vmem:[%s1335_s1 + $0x40] sm:$0xff]  ;;  %v39_v16 = vld [vmem:[%s1335_s1 + $0x38] sm:$0xff] }
   0x6   :  { %24 = vperm.xlu0 %1083, %v17_v5   ;;  %949 = vmatprep.subr.mxu0 %v45_v6  ;;  %v38_v17 = vld [vmem:[%s1335_s1 + $0x30] sm:$0xff]  ;;  %v37_v18 = vld [vmem:[%s1335_s1 + $0x28] sm:$0xff]  ;;  %v36_v19 = vld [vmem:[%s1335_s1 + $0x20] sm:$0xff] }
   0x7   :  { %950 = vmatpush3.msra.mxu0 %v45_v6  ;;  %983 = vmatpush3.msra.mxu1 %v1158_v9  ;;  %v35_v20 = vld [vmem:[%s1335_s1 + $0x18] sm:$0xff]  ;;  %v34_v21 = vld [vmem:[%s1335_s1 + $0x10] sm:$0xff]  ;;  %v33_v22 = vld [vmem:[%s1335_s1 + $0x8] sm:$0xff] }
   0x8   :  { %951 = vmatprep.subr.mxu0 %v44_v7  ;;  %984 = vmatprep.subr.mxu1 %v1101_v3  ;;  %v32_v23 = vld [vmem:[%s1335_s1] sm:$0xff] }
   0x9   :  { %952 = vmatpush3.msra.mxu0 %v44_v7  ;;  %985 = vmatpush3.msra.mxu1 %v1168_v11 }
   0xa   :  { %953 = vmatprep.subr.mxu0 %v43_v10  ;;  %986 = vmatprep.subr.mxu1 %v1101_v3 }
   0xb   :  { %954 = vmatpush3.msra.mxu0 %v43_v10  ;;  %987 = vmatpush3.msra.mxu1 %v1178_v13  ;;  %v765_v10 = vld [vmem:[%s1337_s2 + $0x18] sm:$0xff] }
   0xc   :  { %955 = vmatprep.subr.mxu0 %v42_v12  ;;  %989 = vmatmul.mubr.f32.vlgmr.msra.gmra.mxu1 %v1101_v3 }
   0xd   :  { %956 = vmatpush3.msra.mxu0 %v42_v12  ;;  %991 = vmatprep.subr.mxu1 %v1101_v3  ;;  %v763_v12 = vld [vmem:[%s1337_s2 + $0x8] sm:$0xff] }
   0xe   :  { %957 = vmatprep.subr.mxu0 %v41_v14  ;;  %992 = vmatpush3.msra.mxu1 %v1153_v8 }
   0xf   :  { %958 = vmatpush3.msra.mxu0 %v41_v14  ;;  %993 = vmatprep.subr.mxu1 %v1101_v3 }
  0x10   :  { %959 = vmatprep.subr.mxu0 %v40_v15  ;;  %994 = vmatpush3.msra.mxu1 %v1158_v9 }
  0x11   :  { %960 = vmatpush3.msra.mxu0 %v40_v15  ;;  %995 = vmatprep.subr.mxu1 %v1101_v3 }
  0x12   :  { %961 = vmatprep.subr.mxu0 %v39_v16  ;;  %996 = vmatpush3.msra.mxu1 %v1168_v11 }
  0x13   :  { %962 = vmatpush3.msra.mxu0 %v39_v16  ;;  %997 = vmatprep.subr.mxu1 %v1101_v3 }
  0x14   :  { %963 = vmatprep.subr.mxu0 %v38_v17  ;;  %998 = vmatpush3.msra.mxu1 %v1178_v13 }
  0x15   :  { %964 = vmatpush3.msra.mxu0 %v38_v17  ;;  %999 = vmatprep.mubr.msk.f32.mxu1 %vm1102_vm0, %v1101_v3 }
  0x16   :  { %965 = vmatprep.subr.mxu0 %v37_v18  ;;  %1002 = vmatprep.subr.mxu1 %v1101_v3 }
  0x17   :  { %966 = vmatpush3.msra.mxu0 %v37_v18 }
  0x18   :  { %967 = vmatprep.subr.mxu0 %v36_v19 }
  0x19   :  { %968 = vmatpush3.msra.mxu0 %v36_v19 }
  0x1a   :  { %969 = vmatprep.subr.mxu0 %v35_v20 }
  0x1b   :  { %970 = vmatpush3.msra.mxu0 %v35_v20 }
  0x1c   :  { %971 = vmatprep.subr.mxu0 %v34_v21 }
  0x1d   :  { %972 = vmatpush3.msra.mxu0 %v34_v21  ;;  %v878_v21 = vld [vmem:[%s1337_s2 + $0x20] ss:$0 sm:$0xff] }
  0x1e   :  { %973 = vmatprep.subr.mxu0 %v33_v22 }
  0x1f   :  { %974 = vmatpush3.msra.mxu0 %v33_v22 }
  0x20   :  { %975 = vmatprep.subr.mxu0 %v32_v23 }
  0x21   :  { %976 = vmatpush3.msra.mxu0 %v32_v23 }
  0x22   :  { %1024 = vmatprep.subr.mxu0 %v1101_v3 }
  0x7d   :  { %v22_v26 = vpop.permute.xlu0 %21 }
  0x7e   :  { %vm26_vm1 = vcmp.eq.s32.totalorder %v22_v26, %v19_v25 }
  0x7f   :  { %977 = vmatprep.mubr.msk.f32.mxu0 %vm26_vm1, %v1103_v27 }
  0x81   :  { %v25_v28 = vpop.permute.xlu0 %24 }
  0x82   :  { %vm27_vm2 = vcmp.eq.s32.totalorder %v25_v28, %v19_v25 }
  0x83   :  { %978 = vmatmul.mubr.msk.f32.vlgmr.msra.gmra.mxu0 %vm27_vm2, %v1103_v27 }
  0x84   :  { %1025 = vmatpush3.msra.mxu0 %v1153_v8  ;;  %1032 = vmatprep.mubr.msk.f32.mxu0 %vm1102_vm0, %v1101_v3 }
  0x85   :  { %1026 = vmatprep.subr.mxu0 %v1101_v3 }
  0x86   :  { %1027 = vmatpush3.msra.mxu0 %v1158_v9 }
  0x87   :  { %1028 = vmatprep.subr.mxu0 %v1101_v3 }
  0x88   :  { %1029 = vmatpush3.msra.mxu0 %v1168_v11 }
  0x89   :  { %1030 = vmatprep.subr.mxu0 %v1101_v3 }
  0x8a   :  { %1031 = vmatpush3.msra.mxu0 %v1178_v13 }
  0x8b   :  { %1046 = vmatprep.subr.mxu0 %v1101_v3 }
  0xcc   :  { %v197_v29 = vpop.f32.mrf.mxu1 }
  0xce   :  { %v990_v30 = vpop.f32.mrf.mxu1 }
 0x143   :  { %v1236_v31 = vpop.f32.mrf.mxu0 }
 0x145   :  { %v114_v32 = vpop.f32.mrf.mxu0 }
 0x146   :  { %v201_v33 = vadd.f32 %v197_v29, %v114_v32 }
 0x148   :  { %1084 = vtanh.f32 %v201_v33 }
 0x155   :  { %v1085_v34 = vpop.eup %1084 }
 0x156   :  { %1000 = vmatmul.mubr.msk.f32.vlgmr.msra.gmra.mxu1 %vm127_vm3, %v1085_v34 }
 0x157   :  { %1003 = vmatpush3.msra.mxu1 %v1153_v8  ;;  %1010 = vmatprep.mubr.msk.f32.mxu1 %vm1102_vm0, %v1101_v3 }
 0x158   :  { %1004 = vmatprep.subr.mxu1 %v1101_v3 }
 0x159   :  { %1005 = vmatpush3.msra.mxu1 %v1158_v9 }
 0x15a   :  { %1006 = vmatprep.subr.mxu1 %v1101_v3 }
 0x15b   :  { %1007 = vmatpush3.msra.mxu1 %v1168_v11 }
 0x15c   :  { %1008 = vmatprep.subr.mxu1 %v1101_v3 }
 0x15d   :  { %1009 = vmatpush3.msra.mxu1 %v1178_v13 }
 0x15e   :  { %1013 = vmatprep.subr.mxu1 %v1101_v3 }
 0x216   :  { %v272_v35 = vpop.f32.mrf.mxu1 }
 0x217   :  { %v277_v36 = vrot.slane %v272_v35, 6 }
 0x218   :  { %v1001_v37 = vpop.f32.mrf.mxu1 }
 0x219   :  { %v279_v38 = vadd.f32 %v277_v36, %v114_v32 }
 0x21b   :  { %1086 = vtanh.f32 %v279_v38 }
 0x228   :  { %v1087_v39 = vpop.eup %1086 }
 0x229   :  { %v282_v40 = vrot.slane %v1087_v39, 2  ;;  %v752_v46 = vsel %vm751_vm4, %v1085_v34, %v1087_v39 }
 0x22b   :  { %1011 = vmatmul.mubr.msk.f32.vlgmr.msra.gmra.mxu1 %vm127_vm3, %v282_v40 }
 0x22c   :  { %1014 = vmatpush3.msra.mxu1 %v1153_v8  ;;  %1021 = vmatprep.mubr.msk.f32.mxu1 %vm1102_vm0, %v1101_v3 }
 0x22d   :  { %1015 = vmatprep.subr.mxu1 %v1101_v3 }
 0x22e   :  { %1016 = vmatpush3.msra.mxu1 %v1158_v9 }
 0x22f   :  { %1017 = vmatprep.subr.mxu1 %v1101_v3 }
 0x230   :  { %1018 = vmatpush3.msra.mxu1 %v1168_v11 }
 0x231   :  { %1019 = vmatprep.subr.mxu1 %v1101_v3 }
 0x232   :  { %1020 = vmatpush3.msra.mxu1 %v1178_v13 }
 0x233   :  { %1035 = vmatprep.subr.mxu1 %v1101_v3 }
 0x2eb   :  { %v351_v41 = vpop.f32.mrf.mxu1 }
 0x2ec   :  { %v356_v42 = vrot.slane %v351_v41, 4 }
 0x2ed   :  { %v1012_v43 = vpop.f32.mrf.mxu1 }
 0x2ee   :  { %v358_v44 = vadd.f32 %v356_v42, %v114_v32 }
 0x2f0   :  { %1088 = vtanh.f32 %v358_v44 }
 0x2fd   :  { %v1089_v45 = vpop.eup %1088 }
 0x2fe   :  { %v361_v47 = vrot.slane %v1089_v45, 4  ;;  %v754_v48 = vsel %vm753_vm5, %v752_v46, %v1089_v45 }
 0x300   :  { %1022 = vmatmul.mubr.msk.f32.vlgmr.msra.gmra.mxu1 %vm127_vm3, %v361_v47 }
 0x301   :  { %1036 = vmatpush3.msra.mxu1 %v1153_v8  ;;  %1043 = vmatprep.mubr.msk.f32.mxu1 %vm1102_vm0, %v1101_v3 }
 0x302   :  { %1037 = vmatprep.subr.mxu1 %v1101_v3 }
 0x303   :  { %1038 = vmatpush3.msra.mxu1 %v1158_v9 }
 0x304   :  { %1039 = vmatprep.subr.mxu1 %v1101_v3 }
 0x305   :  { %1040 = vmatpush3.msra.mxu1 %v1168_v11 }
 0x306   :  { %1041 = vmatprep.subr.mxu1 %v1101_v3 }
 0x307   :  { %1042 = vmatpush3.msra.mxu1 %v1178_v13 }
 0x308   :  { %1057 = vmatprep.subr.mxu1 %v1101_v3 }
 0x3c0   :  { %v430_v49 = vpop.f32.mrf.mxu1 }
 0x3c1   :  { %v435_v50 = vrot.slane %v430_v49, 2 }
 0x3c2   :  { %v1023_v51 = vpop.f32.mrf.mxu1 }
 0x3c3   :  { %v437_v52 = vadd.f32 %v435_v50, %v114_v32 }
 0x3c5   :  { %1090 = vtanh.f32 %v437_v52 }
 0x3d2   :  { %v1091_v53 = vpop.eup %1090 }
 0x3d3   :  { %v440_v54 = vrot.slane %v1091_v53, 6  ;;  %v756_v55 = vsel %vm755_vm6, %v754_v48, %v1091_v53 }
 0x3d4   :  { %760 = vst.msk [vmem:[%s1336_s3] sm:$0xff] %vm127_vm3, %v756_v55 }
 0x3d5   :  { %1033 = vmatmul.mubr.msk.f32.vlgmr.msra.gmra.mxu0 %vm127_vm3, %v440_v54 }
 0x3d6   :  { %1047 = vmatpush3.msra.mxu0 %v1153_v8  ;;  %1054 = vmatprep.mubr.msk.f32.mxu0 %vm1102_vm0, %v1101_v3 }
 0x3d7   :  { %1048 = vmatprep.subr.mxu0 %v1101_v3 }
 0x3d8   :  { %1049 = vmatpush3.msra.mxu0 %v1158_v9 }
 0x3d9   :  { %1050 = vmatprep.subr.mxu0 %v1101_v3 }
 0x3da   :  { %1051 = vmatpush3.msra.mxu0 %v1168_v11 }
 0x3db   :  { %1052 = vmatprep.subr.mxu0 %v1101_v3 }
 0x3dc   :  { %1053 = vmatpush3.msra.mxu0 %v1178_v13 }
 0x3dd   :  { %1068 = vmatprep.subr.mxu0 %v765_v10 }
 0x495   :  { %v509_v56 = vpop.f32.mrf.mxu0 }
 0x496   :  { %v513_v57 = vadd.f32 %v1236_v31, %v509_v56 }
 0x497   :  { %v1034_v58 = vpop.f32.mrf.mxu0 }
 0x498   :  { %1092 = vtanh.f32 %v513_v57 }
 0x4a5   :  { %v1093_v59 = vpop.eup %1092 }
 0x4a6   :  { %1044 = vmatmul.mubr.msk.f32.vlgmr.msra.gmra.mxu1 %vm127_vm3, %v1093_v59 }
 0x4a7   :  { %1058 = vmatpush3.msra.mxu1 %v1153_v8  ;;  %1065 = vmatprep.mubr.msk.f32.mxu1 %vm1102_vm0, %v1101_v3 }
 0x4a8   :  { %1059 = vmatprep.subr.mxu1 %v1101_v3 }
 0x4a9   :  { %1060 = vmatpush3.msra.mxu1 %v1158_v9 }
 0x4aa   :  { %1061 = vmatprep.subr.mxu1 %v1101_v3 }
 0x4ab   :  { %1062 = vmatpush3.msra.mxu1 %v1168_v11  ;;  %v764_v11 = vld [vmem:[%s1337_s2 + $0x10] sm:$0xff] }
 0x4ac   :  { %1063 = vmatprep.subr.mxu1 %v1101_v3 }
 0x4ad   :  { %1064 = vmatpush3.msra.mxu1 %v1178_v13  ;;  %v762_v13 = vld [vmem:[%s1337_s2] sm:$0xff] }
 0x566   :  { %v584_v60 = vpop.f32.mrf.mxu1 }
 0x567   :  { %v589_v61 = vrot.slane %v584_v60, 6 }
 0x568   :  { %v1045_v62 = vpop.f32.mrf.mxu1 }
 0x569   :  { %v591_v63 = vadd.f32 %v1236_v31, %v589_v61 }
 0x56b   :  { %1094 = vtanh.f32 %v591_v63 }
 0x578   :  { %v1095_v0 = vpop.eup %1094 }
 0x579   :  { %v594_v1 = vrot.slane %v1095_v0, 2  ;;  %v757_v7 = vsel %vm751_vm4, %v1093_v59, %v1095_v0 }
 0x57b   :  { %1055 = vmatmul.mubr.msk.f32.vlgmr.msra.gmra.mxu0 %vm127_vm3, %v594_v1 }
 0x57c   :  { %1076 = vmatprep.mubr.msk.f32.mxu0 %vm127_vm3, %v756_v55  ;;  %1069 = vmatpush3.msra.mxu0 %v765_v10 }
 0x57d   :  { %1070 = vmatprep.subr.mxu0 %v764_v11 }
 0x57e   :  { %1071 = vmatpush3.msra.mxu0 %v764_v11 }
 0x57f   :  { %1072 = vmatprep.subr.mxu0 %v763_v12 }
 0x580   :  { %1073 = vmatpush3.msra.mxu0 %v763_v12 }
 0x581   :  { %1074 = vmatprep.subr.mxu0 %v762_v13 }
 0x582   :  { %1075 = vmatpush3.msra.mxu0 %v762_v13 }
 0x63b   :  { %v663_v2 = vpop.f32.mrf.mxu0 }
 0x63c   :  { %v668_v4 = vrot.slane %v663_v2, 4 }
 0x63d   :  { %v1056_v5 = vpop.f32.mrf.mxu0 }
 0x63e   :  { %v670_v6 = vadd.f32 %v1236_v31, %v668_v4 }
 0x640   :  { %1096 = vtanh.f32 %v670_v6 }
 0x64d   :  { %v1097_v3 = vpop.eup %1096 }
 0x64e   :  { %v673_v8 = vrot.slane %v1097_v3, 4  ;;  %v758_v9 = vsel %vm753_vm5, %v757_v7, %v1097_v3 }
 0x650   :  { %1066 = vmatmul.mubr.msk.f32.vlgmr.msra.gmra.mxu1 %vm127_vm3, %v673_v8 }
 0x710   :  { %v742_v14 = vpop.f32.mrf.mxu1 }
 0x711   :  { %v747_v15 = vrot.slane %v742_v14, 2 }
 0x712   :  { %v1067_v16 = vpop.f32.mrf.mxu1 }
 0x713   :  { %v749_v17 = vadd.f32 %v1236_v31, %v747_v15 }
 0x715   :  { %1098 = vtanh.f32 %v749_v17 }
 0x722   :  { %v1099_v18 = vpop.eup %1098 }
 0x723   :  { %v759_v19 = vsel %vm755_vm6, %v758_v9, %v1099_v18 }
 0x724   :  { %761 = vst.msk [vmem:[%s1336_s3 + $0x8] sm:$0xff] %vm127_vm3, %v759_v19  ;;  %1077 = vmatmul.mubr.msk.f32.vlgmr.msra.gmra.mxu0 %vm127_vm3, %v759_v19 }
 0x7e4   :  { %v1078_v20 = vpop.f32.mrf.mxu0 }
 0x7e5   :  { %v849_v24 = vadd.f32 %v1078_v20, %v878_v21 }
 0x7e6   :  { %v843_v22 = vpop.f32.mrf.mxu0 }
 0x7e7   :  { %v844_v23 = vadd.f32 %v878_v21, %v843_v22 }
 0x7e9   :  { %852 = vmax.index.xlane.f32.xlu1 %v844_v23 }
 0x7ed   :  { %854 = vmax.index.xlane.f32.xlu1 %v849_v24 }
 0x872   :  { %v853_v25 = vpop.xlane.xlu1 %852 }
 0x873   :  { %857 = vst.msk [vmem:[%s1338_s4] sm:$0xff] %vm856_vm7, %v853_v25 }
 0x876   :  { %v855_v26 = vpop.xlane.xlu1 %854 }
 0x877   :  { %858 = vst.msk [vmem:[%s1338_s4 + $0x8] sm:$0xff] %vm856_vm7, %v855_v26 }

</bundles_post_ra>
